<compile_context>
chip_gen: v5e
topology: v5e:2x2
jax: 0.10.0
libtpu: 0.0.40
codegen_flags: <defaults>
</compile_context>

<pallas_src>
import jax
import jax.numpy as jnp
from jax.experimental import pallas as pl
from jax.experimental.pallas import tpu as pltpu


def _round_up(x, m):
    return ((x + m - 1) // m) * m


def _mlp_logsoftmax_kernel(x_ref, w1_ref, b1_ref, w2_ref, b2_ref, o_ref):
    # ---- Linear 1 + ReLU: bf16 MXU matmul, f32 accumulate + f32 elementwise ----
    x = x_ref[...].astype(jnp.bfloat16)                     # cast in-kernel (stream raw f32)
    h = jnp.dot(x, w1_ref[...], preferred_element_type=jnp.float32)
    h = jnp.maximum(h + b1_ref[...], 0.0)                   # (bt, H) + (1, H) broadcast

    # ---- Linear 2: bf16 MXU matmul, f32 accumulate ----
    logits = jnp.dot(h.astype(jnp.bfloat16), w2_ref[...],
                     preferred_element_type=jnp.float32)
    logits = logits + b2_ref[...]                            # (bt, C) + (1, C) broadcast

    # ---- Numerically stable LogSoftmax along the (unpadded) class axis ----
    m = jnp.max(logits, axis=-1, keepdims=True)
    shifted = logits - m
    lse = jnp.log(jnp.sum(jnp.exp(shifted), axis=-1, keepdims=True))
    o_ref[...] = (shifted - lse).astype(o_ref.dtype)


def _choose_batch_tile(B, block_b):
    """Pick a batch tile (multiple of 8) and the padded batch size it divides."""
    Bp8 = _round_up(max(B, 8), 8)
    bt = _round_up(max(block_b, 8), 8)
    if Bp8 >= 16:
        # Keep >= 2 grid steps so v7x's two TensorCores both get work.
        bt = min(bt, _round_up(-(-Bp8 // 2), 8))
    bt = min(bt, Bp8)
    Bp = _round_up(Bp8, bt)
    return bt, Bp


def mlp_forward(x, w1, b1, w2, b2, *, block_b=1024):
    """Pallas TPU forward pass equivalent to:
         LogSoftmax(ReLU(x @ W1 + b1) @ W2 + b2)
    x:  (B, F) float32
    w1: (F, H), b1: (1, H)
    w2: (H, C), b2: (1, C)
    returns (B, C) float32 log-probabilities.
    """
    B, F = x.shape
    H = w1.shape[1]
    C = w2.shape[1]

    bt, Bp = _choose_batch_tile(B, block_b)
    grid = (Bp // bt,)

    # Pad only the batch dim (zeros -> finite garbage rows, sliced off below).
    xp = x if Bp == B else jnp.zeros((Bp, F), x.dtype).at[:B].set(x)
    # Weights to bf16 once (tiny, grid-invariant, resident in VMEM); biases f32.
    w1b = w1.astype(jnp.bfloat16)
    w2b = w2.astype(jnp.bfloat16)
    b1f = b1.astype(jnp.float32).reshape(1, H)
    b2f = b2.astype(jnp.float32).reshape(1, C)

    cost = pl.CostEstimate(
        flops=2 * Bp * (F * H + H * C),
        transcendentals=Bp * C + Bp,                 # exp per logit + log per row
        bytes_accessed=(Bp * F * 4 + F * H * 2 + H * 4
                        + H * C * 2 + C * 4 + Bp * C * 4),
    )

    out_padded = pl.pallas_call(
        _mlp_logsoftmax_kernel,
        out_shape=jax.ShapeDtypeStruct((Bp, C), jnp.float32),
        grid_spec=pltpu.PrefetchScalarGridSpec(
            num_scalar_prefetch=0,
            grid=grid,
            in_specs=[
                pl.BlockSpec((bt, F), lambda i: (i, 0)),   # streamed x tile (raw f32)
                pl.BlockSpec((F, H), lambda i: (0, 0)),    # resident W1 (bf16)
                pl.BlockSpec((1, H), lambda i: (0, 0)),    # resident b1 (f32)
                pl.BlockSpec((H, C), lambda i: (0, 0)),    # resident W2 (bf16)
                pl.BlockSpec((1, C), lambda i: (0, 0)),    # resident b2 (f32)
            ],
            out_specs=pl.BlockSpec((bt, C), lambda i: (i, 0)),  # narrow (B, C) output
        ),
        compiler_params=pltpu.CompilerParams(
            dimension_semantics=("parallel",),   # megacore sharding on v7x
        ),
        cost_estimate=cost,
    )(xp, w1b, b1f, w2b, b2f)

    return out_padded[:B] if Bp != B else out_padded


def _init_linear(key, fan_in, fan_out):
    # Mimic torch.nn.Linear default init: U(-1/sqrt(fan_in), 1/sqrt(fan_in)).
    kw, kb = jax.random.split(key)
    bound = 1.0 / (fan_in ** 0.5)
    w = jax.random.uniform(kw, (fan_in, fan_out), jnp.float32, -bound, bound)
    b = jax.random.uniform(kb, (1, fan_out), jnp.float32, -bound, bound)
    return w, b


if __name__ == "__main__":
    key = jax.random.PRNGKey(0)
    k_x, k_l1, k_l2 = jax.random.split(key, 3)

    # Tabular MLP shapes implied by TorchModel; batch large enough to exercise
    # the batch-tiled grid (2 tiles of 256 rows with the v7x >=2-step cap).
    batch, in_features, hidden, n_classes = 512, 32, 32, 8

    x = jax.random.normal(k_x, (batch, in_features), jnp.float32)
    w1, b1 = _init_linear(k_l1, in_features, hidden)
    w2, b2 = _init_linear(k_l2, hidden, n_classes)

    out = mlp_forward(x, w1, b1, w2, b2, block_b=1024)
    jax.block_until_ready(out)

    # Reference in plain f32 JAX (same semantics as the torch Sequential).
    # bf16 matmul inputs inside the kernel loosen the tolerance vs pure f32.
    h_ref = jnp.maximum(x @ w1 + b1, 0.0)
    logits_ref = h_ref @ w2 + b2
    ref = jax.nn.log_softmax(logits_ref, axis=-1)

    assert out.shape == (batch, n_classes)
    assert jnp.all(jnp.isfinite(out)), "non-finite log-probabilities"
    assert jnp.allclose(out, ref, atol=5e-2, rtol=0.0), "mismatch vs f32 reference"
    # Valid log-probabilities: exp sums to 1 per row.
    row_sums = jnp.sum(jnp.exp(out), axis=-1)
    assert jnp.allclose(row_sums, 1.0, atol=1e-3), "probabilities do not sum to 1"

    print("KERNEL_OK")
</pallas_src>

<mosaic_0001>
module attributes {stable_mosaic.version = 11 : i64} {
  func.func @_mlp_logsoftmax_kernel(%arg0: i32, %arg1: memref<256x32xf32, #tpu.memory_space<vmem>>, %arg2: memref<32x32xbf16, #tpu.memory_space<vmem>>, %arg3: memref<1x32xf32, #tpu.memory_space<vmem>>, %arg4: memref<32x8xbf16, #tpu.memory_space<vmem>>, %arg5: memref<1x8xf32, #tpu.memory_space<vmem>>, %arg6: memref<256x8xf32, #tpu.memory_space<vmem>>) attributes {dimension_semantics = [#tpu.dimension_semantics<parallel>], iteration_bounds = array<i64: 2>, scalar_prefetch = 0 : i64, scratch_operands = 0 : i64, tpu.core_type = #tpu.core_type<tc>, window_params = [{transform_indices = @transform_0, window_bounds = array<i64: 256, 32>}, {pipeline_mode = #tpu.pipeline_mode<synchronous>, transform_indices = @transform_1, window_bounds = array<i64: 32, 32>}, {pipeline_mode = #tpu.pipeline_mode<synchronous>, transform_indices = @transform_2, window_bounds = array<i64: 1, 32>}, {pipeline_mode = #tpu.pipeline_mode<synchronous>, transform_indices = @transform_3, window_bounds = array<i64: 32, 8>}, {pipeline_mode = #tpu.pipeline_mode<synchronous>, transform_indices = @transform_4, window_bounds = array<i64: 1, 8>}, {transform_indices = @transform_5, window_bounds = array<i64: 256, 8>}]} {
    %c0 = arith.constant 0 : index
    %c0_0 = arith.constant 0 : index
    %0 = vector.load %arg1[%c0, %c0_0] : memref<256x32xf32, #tpu.memory_space<vmem>>, vector<256x32xf32>
    %1 = arith.truncf %0 : vector<256x32xf32> to vector<256x32xbf16>
    %c0_1 = arith.constant 0 : index
    %c0_2 = arith.constant 0 : index
    %2 = vector.load %arg2[%c0_1, %c0_2] : memref<32x32xbf16, #tpu.memory_space<vmem>>, vector<32x32xbf16>
    %cst = arith.constant dense<0.000000e+00> : vector<256x32xf32>
    %3 = tpu.matmul %1, %2, %cst {dimension_numbers = #tpu.dot_dimension_numbers<[1], [0], [0], [1], [0, 0, 1, 1], [], []>} : vector<256x32xbf16>, vector<32x32xbf16>, vector<256x32xf32> -> vector<256x32xf32>
    %c0_3 = arith.constant 0 : index
    %c0_4 = arith.constant 0 : index
    %4 = vector.load %arg3[%c0_3, %c0_4] : memref<1x32xf32, #tpu.memory_space<vmem>>, vector<1x32xf32>
    %5 = vector.broadcast %4 : vector<1x32xf32> to vector<256x32xf32>
    %6 = arith.addf %3, %5 : vector<256x32xf32>
    %cst_5 = arith.constant 0.000000e+00 : f32
    %7 = vector.broadcast %cst_5 : f32 to vector<256x32xf32>
    %8 = arith.maximumf %6, %7 : vector<256x32xf32>
    %9 = arith.truncf %8 : vector<256x32xf32> to vector<256x32xbf16>
    %c0_6 = arith.constant 0 : index
    %c0_7 = arith.constant 0 : index
    %10 = vector.load %arg4[%c0_6, %c0_7] : memref<32x8xbf16, #tpu.memory_space<vmem>>, vector<32x8xbf16>
    %cst_8 = arith.constant dense<0.000000e+00> : vector<256x8xf32>
    %11 = tpu.matmul %9, %10, %cst_8 {dimension_numbers = #tpu.dot_dimension_numbers<[1], [0], [0], [1], [0, 0, 1, 1], [], []>} : vector<256x32xbf16>, vector<32x8xbf16>, vector<256x8xf32> -> vector<256x8xf32>
    %c0_9 = arith.constant 0 : index
    %c0_10 = arith.constant 0 : index
    %12 = vector.load %arg5[%c0_9, %c0_10] : memref<1x8xf32, #tpu.memory_space<vmem>>, vector<1x8xf32>
    %13 = vector.broadcast %12 : vector<1x8xf32> to vector<256x8xf32>
    %14 = arith.addf %11, %13 : vector<256x8xf32>
    %cst_11 = arith.constant dense<0xFF800000> : vector<256xf32>
    %15 = vector.multi_reduction <maximumf>, %14, %cst_11 [1] : vector<256x8xf32> to vector<256xf32>
    %16 = vector.shape_cast %15 : vector<256xf32> to vector<256x1xf32>
    %17 = vector.broadcast %16 : vector<256x1xf32> to vector<256x8xf32>
    %18 = arith.subf %14, %17 : vector<256x8xf32>
    %19 = math.exp %18 : vector<256x8xf32>
    %cst_12 = arith.constant dense<0.000000e+00> : vector<256xf32>
    %20 = vector.multi_reduction <add>, %19, %cst_12 [1] : vector<256x8xf32> to vector<256xf32>
    %21 = vector.shape_cast %20 : vector<256xf32> to vector<256x1xf32>
    %22 = math.log %21 : vector<256x1xf32>
    %23 = vector.broadcast %22 : vector<256x1xf32> to vector<256x8xf32>
    %24 = arith.subf %18, %23 : vector<256x8xf32>
    %c0_13 = arith.constant 0 : index
    %c0_14 = arith.constant 0 : index
    %25 = vector.load %arg6[%c0_13, %c0_14] : memref<256x8xf32, #tpu.memory_space<vmem>>, vector<256x8xf32>
    tpu.vector_store %arg6[%c0_13, %c0_14], %24 {strides = array<i32>} : memref<256x8xf32, #tpu.memory_space<vmem>>, vector<256x8xf32>,
    return
  }
  func.func @transform_0(%arg0: i32) -> (i32, i32) {
    %c0_i32 = arith.constant 0 : i32
    %c0_i32_0 = arith.constant 0 : i32
    return %arg0, %c0_i32 : i32, i32
  }
  func.func @transform_1(%arg0: i32) -> (i32, i32) {
    %c0_i32 = arith.constant 0 : i32
    %c0_i32_0 = arith.constant 0 : i32
    %c0_i32_1 = arith.constant 0 : i32
    return %c0_i32, %c0_i32_0 : i32, i32
  }
  func.func @transform_2(%arg0: i32) -> (i32, i32) {
    %c0_i32 = arith.constant 0 : i32
    %c0_i32_0 = arith.constant 0 : i32
    %c0_i32_1 = arith.constant 0 : i32
    return %c0_i32, %c0_i32_0 : i32, i32
  }
  func.func @transform_3(%arg0: i32) -> (i32, i32) {
    %c0_i32 = arith.constant 0 : i32
    %c0_i32_0 = arith.constant 0 : i32
    %c0_i32_1 = arith.constant 0 : i32
    return %c0_i32, %c0_i32_0 : i32, i32
  }
  func.func @transform_4(%arg0: i32) -> (i32, i32) {
    %c0_i32 = arith.constant 0 : i32
    %c0_i32_0 = arith.constant 0 : i32
    %c0_i32_1 = arith.constant 0 : i32
    return %c0_i32, %c0_i32_0 : i32, i32
  }
  func.func @transform_5(%arg0: i32) -> (i32, i32) {
    %c0_i32 = arith.constant 0 : i32
    %c0_i32_0 = arith.constant 0 : i32
    return %arg0, %c0_i32 : i32, i32
  }
}

</mosaic_0001>

<bundles_post_ra>
// kernel: tpu_custom_call.1
= control target key start
LH: loop header
LB: loop body
LE: loop exit
PB: predicated region body
PF: predicated region fallthrough
CT: control target
= control target key end

     0   :  { %s1356_s18 = smov 0   ;;  %s1918_s0 = inlined_call_operand.vmem [shape: f32[512,32], index: 0, kind: input, shape index: {}]   ;;  %s1919_s1 = inlined_call_operand.vmem [shape: bf16[32,32], index: 1, kind: input, shape index: {}]   ;;  %s1920_s2 = inlined_call_operand.vmem [shape: f32[1,32], index: 2, kind: input, shape index: {}]   ;;  %s1921_s3 = inlined_call_operand.vmem [shape: bf16[32,8], index: 3, kind: input, shape index: {}]   ;;  %s1922_s4 = inlined_call_operand.vmem [shape: f32[1,8], index: 4, kind: input, shape index: {}]   ;;  %s1923_s5 = inlined_call_operand.vmem [shape: f32[512,8], index: 5, kind: output, shape index: {}]  }
   0x1 LB: > { %s1113_s19 = sadd.s32 4294967295, %s1324_s18   ;;  %p1117_p0 = scmp.ge.s32.totalorder %s1324_s18, 1  ;;  %s1324_s18 = sphi %s1356_s18, %s15_s18  }
   0x2   : > { %p188_p1 = scmp.lt.s32.totalorder %s1324_s18, 3 }
   0x4   : > { %p189_p2 = pnand %p1117_p0, %p188_p1 }
   0x5   : > { %s1118_s22 = sshll.u32 (!%p189_p2), %s1113_s19, 5 }
   0x6   : > { %192 = sbr.rel (%p189_p2) target bundleno = 677 (0x2a5), region = 40  ;;  %p217_p3 = scmp.lt.s32.totalorder (!%p189_p2), %s1118_s22, 63 }
   0xb   : > { %v1173_v0 = vld [vmem:[%s1919_s1 + $0x8] sm:$0xff]  ;;  %v1172_v1 = vld [vmem:[%s1919_s1] sm:$0xff]  ;;  %s1925_s22 = smov (!%p217_p3, %s1118_s22), 63  ;;  %vm297_vm0 = vcmask 261120   ;;  %vm640_vm1 = vcmask 64512  }
   0xc   : > { %352 = vmatpush.bf16.msra.mxu0 %v1173_v0  ;;  %1176 = vmatpush.bf16.msra.mxu2 %v1173_v0  ;;  %s1119_s25 = sshll.u32 %s1925_s22, 3  ;;  %v1175_v44 = vld [vmem:[%s1921_s3 + $0x8] sm:$0xff]  ;;  %v1174_v45 = vld [vmem:[%s1921_s3] sm:$0xff] }
   0xd   : > { %s1378_s28 = scalar_lea.vmem %s1918_s0, %s1119_s25  ;;  %557 = vmatpush.bf16.msra.mxu1 %v1175_v44  ;;  %1178 = vmatpush.bf16.msra.mxu3 %v1175_v44  ;;  %v1437_v53 = vld [vmem:[%s1920_s2] ss:$0 sm:$0xff]  ;;  %s1815_s14 = scalar_lea.vmem %s1923_s5, %s1119_s25 }
   0xe   : > { %v229_v2 = vld [vmem:[%s1378_s28] sm:$0xff]  ;;  %v230_v3 = vld [vmem:[%s1378_s28 + $0x8] sm:$0xff]  ;;  %v231_v8 = vld [vmem:[%s1378_s28 + $0x10] sm:$0xff] }
   0xf   : > { %v245_v4 = vld [vmem:[%s1378_s28 + $0x80] sm:$0xff]  ;;  %v261_v5 = vpack.c.bf16 %v230_v3, %v229_v2  ;;  %v246_v6 = vld [vmem:[%s1378_s28 + $0x88] sm:$0xff]  ;;  %v232_v9 = vld [vmem:[%s1378_s28 + $0x18] sm:$0xff] }
  0x10   : > { %353 = vmatpush.bf16.msra.mxu0 %v1172_v1  ;;  %1177 = vmatpush.bf16.msra.mxu2 %v1172_v1  ;;  %v269_v7 = vpack.c.bf16 %v246_v6, %v245_v4  ;;  %v247_v10 = vld [vmem:[%s1378_s28 + $0x90] sm:$0xff]  ;;  %v248_v11 = vld [vmem:[%s1378_s28 + $0x98] sm:$0xff]  ;;  %v262_v12 = vpack.c.bf16 %v232_v9, %v231_v8  ;;  %v233_v14 = vld [vmem:[%s1378_s28 + $0x20] sm:$0xff] }
  0x11   : > { %v270_v13 = vpack.c.bf16 %v248_v11, %v247_v10  ;;  %v234_v15 = vld [vmem:[%s1378_s28 + $0x28] sm:$0xff]  ;;  %v249_v16 = vld [vmem:[%s1378_s28 + $0xa0] sm:$0xff]  ;;  %v235_v20 = vld [vmem:[%s1378_s28 + $0x30] sm:$0xff]  ;;  %558 = vmatpush.bf16.msra.mxu1 %v1174_v45  ;;  %1179 = vmatpush.bf16.msra.mxu3 %v1174_v45 }
  0x12   : > { %v250_v17 = vld [vmem:[%s1378_s28 + $0xa8] sm:$0xff]  ;;  %v263_v18 = vpack.c.bf16 %v234_v15, %v233_v14  ;;  %v236_v21 = vld [vmem:[%s1378_s28 + $0x38] sm:$0xff]  ;;  %v251_v22 = vld [vmem:[%s1378_s28 + $0xb0] sm:$0xff] }
  0x13   : > { %1130 = vmatmul.msk.bf16.vlgmr.msra.gmra.mxu0 %vm297_vm0, %v261_v5  ;;  %1138 = vmatmul.msk.bf16.vlgmr.msra.gmra.mxu2 %vm297_vm0, %v269_v7  ;;  %v271_v19 = vpack.c.bf16 %v250_v17, %v249_v16  ;;  %v252_v23 = vld [vmem:[%s1378_s28 + $0xb8] sm:$0xff]  ;;  %v264_v24 = vpack.c.bf16 %v236_v21, %v235_v20  ;;  %v237_v26 = vld [vmem:[%s1378_s28 + $0x40] sm:$0xff]  ;;  %v238_v27 = vld [vmem:[%s1378_s28 + $0x48] sm:$0xff] }
  0x14   : > { %v272_v25 = vpack.c.bf16 %v252_v23, %v251_v22  ;;  %v253_v28 = vld [vmem:[%s1378_s28 + $0xc0] sm:$0xff]  ;;  %v254_v29 = vld [vmem:[%s1378_s28 + $0xc8] sm:$0xff]  ;;  %v265_v30 = vpack.c.bf16 %v238_v27, %v237_v26  ;;  %v239_v32 = vld [vmem:[%s1378_s28 + $0x50] sm:$0xff] }
  0x15   : > { %v273_v31 = vpack.c.bf16 %v254_v29, %v253_v28  ;;  %v240_v33 = vld [vmem:[%s1378_s28 + $0x58] sm:$0xff]  ;;  %v255_v34 = vld [vmem:[%s1378_s28 + $0xd0] sm:$0xff]  ;;  %v241_v38 = vld [vmem:[%s1378_s28 + $0x60] sm:$0xff] }
  0x16   : > { %v256_v35 = vld [vmem:[%s1378_s28 + $0xd8] sm:$0xff]  ;;  %v266_v36 = vpack.c.bf16 %v240_v33, %v239_v32  ;;  %v242_v39 = vld [vmem:[%s1378_s28 + $0x68] sm:$0xff]  ;;  %v257_v40 = vld [vmem:[%s1378_s28 + $0xe0] sm:$0xff] }
  0x17   : > { %v274_v37 = vpack.c.bf16 %v256_v35, %v255_v34  ;;  %v258_v41 = vld [vmem:[%s1378_s28 + $0xe8] sm:$0xff]  ;;  %v267_v42 = vpack.c.bf16 %v242_v39, %v241_v38  ;;  %v243_v46 = vld [vmem:[%s1378_s28 + $0x70] sm:$0xff]  ;;  %v244_v47 = vld [vmem:[%s1378_s28 + $0x78] sm:$0xff] }
  0x18   : > { %v275_v43 = vpack.c.bf16 %v258_v41, %v257_v40  ;;  %v259_v48 = vld [vmem:[%s1378_s28 + $0xf0] sm:$0xff]  ;;  %v260_v49 = vld [vmem:[%s1378_s28 + $0xf8] sm:$0xff]  ;;  %v268_v50 = vpack.c.bf16 %v244_v47, %v243_v46 }
  0x19   : > { %v276_v51 = vpack.c.bf16 %v260_v49, %v259_v48 }
  0x23   : > { %1131 = vmatmul.msk.bf16.gmra.mxu0 %vm297_vm0, %v262_v12  ;;  %1139 = vmatmul.msk.bf16.gmra.mxu2 %vm297_vm0, %v270_v13 }
  0x33   : > { %1132 = vmatmul.msk.bf16.gmra.mxu0 %vm297_vm0, %v263_v18  ;;  %1140 = vmatmul.msk.bf16.gmra.mxu2 %vm297_vm0, %v271_v19 }
  0x43   : > { %1133 = vmatmul.msk.bf16.gmra.mxu0 %vm297_vm0, %v264_v24  ;;  %1141 = vmatmul.msk.bf16.gmra.mxu2 %vm297_vm0, %v272_v25 }
  0x53   : > { %1134 = vmatmul.msk.bf16.gmra.mxu0 %vm297_vm0, %v265_v30  ;;  %1142 = vmatmul.msk.bf16.gmra.mxu2 %vm297_vm0, %v273_v31 }
  0x63   : > { %1135 = vmatmul.msk.bf16.gmra.mxu0 %vm297_vm0, %v266_v36  ;;  %1143 = vmatmul.msk.bf16.gmra.mxu2 %vm297_vm0, %v274_v37 }
  0x73   : > { %1136 = vmatmul.msk.bf16.gmra.mxu0 %vm297_vm0, %v267_v42  ;;  %1144 = vmatmul.msk.bf16.gmra.mxu2 %vm297_vm0, %v275_v43 }
  0x83   : > { %1137 = vmatmul.msk.bf16.gmra.mxu0 %vm297_vm0, %v268_v50  ;;  %1145 = vmatmul.msk.bf16.gmra.mxu2 %vm297_vm0, %v276_v51 }
  0x90   : > { %v355_v52 = vpop.f32.mrf.mxu0 }
  0x91   : > { %v356_v54 = vadd.f32 %v1437_v53, %v355_v52 }
  0x93   : > { %v435_v58 = vmax.f32 %v356_v54, 0.0 }
  0x96   : > { %v395_v55 = vpop.f32.mrf.mxu2 }
  0x97   : > { %v396_v61 = vadd.f32 %v1437_v53, %v395_v55 }
  0x98   : > { %v357_v56 = vpop.f32.mrf.mxu0 }
  0x99   : > { %v358_v57 = vadd.f32 %v1437_v53, %v357_v56  ;;  %v451_v1 = vmax.f32 %v396_v61, 0.0 }
  0x9b   : > { %v436_v59 = vmax.f32 %v358_v57, 0.0 }
  0x9d   : > { %v467_v60 = vpack.c.bf16 %v436_v59, %v435_v58 }
  0x9e   : > { %v397_v62 = vpop.f32.mrf.mxu2 }
  0x9f   : > { %1154 = vmatmul.msk.bf16.vlgmr.msra.gmra.mxu1 %vm297_vm0, %v467_v60  ;;  %v398_v63 = vadd.f32 %v1437_v53, %v397_v62 }
  0xa0   : > { %v360_v0 = vpop.f32.mrf.mxu0 }
  0xa1   : > { %v452_v2 = vmax.f32 %v398_v63, 0.0  ;;  %v361_v4 = vadd.f32 %v1437_v53, %v360_v0 }
  0xa3   : > { %v475_v3 = vpack.c.bf16 %v452_v2, %v451_v1  ;;  %v437_v8 = vmax.f32 %v361_v4, 0.0 }
  0xa5   : > { %1162 = vmatmul.msk.bf16.vlgmr.msra.gmra.mxu3 %vm297_vm0, %v475_v3 }
  0xa6   : > { %v400_v5 = vpop.f32.mrf.mxu2 }
  0xa7   : > { %v401_v11 = vadd.f32 %v1437_v53, %v400_v5 }
  0xa8   : > { %v362_v6 = vpop.f32.mrf.mxu0 }
  0xa9   : > { %v363_v7 = vadd.f32 %v1437_v53, %v362_v6  ;;  %v453_v15 = vmax.f32 %v401_v11, 0.0 }
  0xab   : > { %v438_v9 = vmax.f32 %v363_v7, 0.0 }
  0xad   : > { %v468_v10 = vpack.c.bf16 %v438_v9, %v437_v8 }
  0xae   : > { %v402_v12 = vpop.f32.mrf.mxu2 }
  0xaf   : > { %1155 = vmatmul.msk.bf16.gmra.mxu1 %vm297_vm0, %v468_v10  ;;  %v403_v13 = vadd.f32 %v1437_v53, %v402_v12 }
  0xb0   : > { %v365_v14 = vpop.f32.mrf.mxu0 }
  0xb1   : > { %v454_v16 = vmax.f32 %v403_v13, 0.0  ;;  %v366_v18 = vadd.f32 %v1437_v53, %v365_v14 }
  0xb3   : > { %v476_v17 = vpack.c.bf16 %v454_v16, %v453_v15  ;;  %v439_v22 = vmax.f32 %v366_v18, 0.0 }
  0xb5   : > { %1163 = vmatmul.msk.bf16.gmra.mxu3 %vm297_vm0, %v476_v17 }
  0xb6   : > { %v405_v19 = vpop.f32.mrf.mxu2 }
  0xb7   : > { %v406_v25 = vadd.f32 %v1437_v53, %v405_v19 }
  0xb8   : > { %v367_v20 = vpop.f32.mrf.mxu0 }
  0xb9   : > { %v368_v21 = vadd.f32 %v1437_v53, %v367_v20  ;;  %v455_v29 = vmax.f32 %v406_v25, 0.0 }
  0xbb   : > { %v440_v23 = vmax.f32 %v368_v21, 0.0 }
  0xbd   : > { %v469_v24 = vpack.c.bf16 %v440_v23, %v439_v22 }
  0xbe   : > { %v407_v26 = vpop.f32.mrf.mxu2 }
  0xbf   : > { %1156 = vmatmul.msk.bf16.gmra.mxu1 %vm297_vm0, %v469_v24  ;;  %v408_v27 = vadd.f32 %v1437_v53, %v407_v26 }
  0xc0   : > { %v370_v28 = vpop.f32.mrf.mxu0 }
  0xc1   : > { %v456_v30 = vmax.f32 %v408_v27, 0.0  ;;  %v371_v32 = vadd.f32 %v1437_v53, %v370_v28 }
  0xc3   : > { %v477_v31 = vpack.c.bf16 %v456_v30, %v455_v29  ;;  %v441_v36 = vmax.f32 %v371_v32, 0.0 }
  0xc5   : > { %1164 = vmatmul.msk.bf16.gmra.mxu3 %vm297_vm0, %v477_v31 }
  0xc6   : > { %v410_v33 = vpop.f32.mrf.mxu2 }
  0xc7   : > { %v411_v39 = vadd.f32 %v1437_v53, %v410_v33 }
  0xc8   : > { %v372_v34 = vpop.f32.mrf.mxu0 }
  0xc9   : > { %v373_v35 = vadd.f32 %v1437_v53, %v372_v34  ;;  %v457_v43 = vmax.f32 %v411_v39, 0.0 }
  0xcb   : > { %v442_v37 = vmax.f32 %v373_v35, 0.0 }
  0xcd   : > { %v470_v38 = vpack.c.bf16 %v442_v37, %v441_v36 }
  0xce   : > { %v412_v40 = vpop.f32.mrf.mxu2 }
  0xcf   : > { %1157 = vmatmul.msk.bf16.gmra.mxu1 %vm297_vm0, %v470_v38  ;;  %v413_v41 = vadd.f32 %v1437_v53, %v412_v40  ;;  %v1490_v38 = vld [vmem:[%s1922_s4] ss:$0 sm:$0xff] }
  0xd0   : > { %v375_v42 = vpop.f32.mrf.mxu0 }
  0xd1   : > { %v458_v44 = vmax.f32 %v413_v41, 0.0  ;;  %v376_v46 = vadd.f32 %v1437_v53, %v375_v42 }
  0xd3   : > { %v478_v45 = vpack.c.bf16 %v458_v44, %v457_v43  ;;  %v443_v50 = vmax.f32 %v376_v46, 0.0 }
  0xd5   : > { %1165 = vmatmul.msk.bf16.gmra.mxu3 %vm297_vm0, %v478_v45 }
  0xd6   : > { %v415_v47 = vpop.f32.mrf.mxu2 }
  0xd7   : > { %v416_v54 = vadd.f32 %v1437_v53, %v415_v47 }
  0xd8   : > { %v377_v48 = vpop.f32.mrf.mxu0 }
  0xd9   : > { %v378_v49 = vadd.f32 %v1437_v53, %v377_v48  ;;  %v459_v58 = vmax.f32 %v416_v54, 0.0 }
  0xdb   : > { %v444_v51 = vmax.f32 %v378_v49, 0.0 }
  0xdd   : > { %v471_v52 = vpack.c.bf16 %v444_v51, %v443_v50 }
  0xde   : > { %v417_v55 = vpop.f32.mrf.mxu2 }
  0xdf   : > { %1158 = vmatmul.msk.bf16.gmra.mxu1 %vm297_vm0, %v471_v52  ;;  %v418_v56 = vadd.f32 %v1437_v53, %v417_v55 }
  0xe0   : > { %v380_v57 = vpop.f32.mrf.mxu0 }
  0xe1   : > { %v460_v59 = vmax.f32 %v418_v56, 0.0  ;;  %v381_v61 = vadd.f32 %v1437_v53, %v380_v57 }
  0xe3   : > { %v479_v60 = vpack.c.bf16 %v460_v59, %v459_v58  ;;  %v445_v1 = vmax.f32 %v381_v61, 0.0 }
  0xe5   : > { %1166 = vmatmul.msk.bf16.gmra.mxu3 %vm297_vm0, %v479_v60 }
  0xe6   : > { %v420_v62 = vpop.f32.mrf.mxu2 }
  0xe7   : > { %v421_v4 = vadd.f32 %v1437_v53, %v420_v62 }
  0xe8   : > { %v382_v63 = vpop.f32.mrf.mxu0 }
  0xe9   : > { %v383_v0 = vadd.f32 %v1437_v53, %v382_v63  ;;  %v461_v8 = vmax.f32 %v421_v4, 0.0 }
  0xeb   : > { %v446_v2 = vmax.f32 %v383_v0, 0.0 }
  0xed   : > { %v472_v3 = vpack.c.bf16 %v446_v2, %v445_v1 }
  0xee   : > { %v422_v5 = vpop.f32.mrf.mxu2 }
  0xef   : > { %1159 = vmatmul.msk.bf16.gmra.mxu1 %vm297_vm0, %v472_v3  ;;  %v423_v6 = vadd.f32 %v1437_v53, %v422_v5 }
  0xf0   : > { %v385_v7 = vpop.f32.mrf.mxu0 }
  0xf1   : > { %v462_v9 = vmax.f32 %v423_v6, 0.0  ;;  %v386_v11 = vadd.f32 %v1437_v53, %v385_v7 }
  0xf3   : > { %v480_v10 = vpack.c.bf16 %v462_v9, %v461_v8  ;;  %v447_v15 = vmax.f32 %v386_v11, 0.0 }
  0xf5   : > { %1167 = vmatmul.msk.bf16.gmra.mxu3 %vm297_vm0, %v480_v10 }
  0xf6   : > { %v425_v12 = vpop.f32.mrf.mxu2 }
  0xf7   : > { %v426_v18 = vadd.f32 %v1437_v53, %v425_v12 }
  0xf8   : > { %v387_v13 = vpop.f32.mrf.mxu0 }
  0xf9   : > { %v388_v14 = vadd.f32 %v1437_v53, %v387_v13  ;;  %v463_v22 = vmax.f32 %v426_v18, 0.0 }
  0xfb   : > { %v448_v16 = vmax.f32 %v388_v14, 0.0 }
  0xfd   : > { %v473_v17 = vpack.c.bf16 %v448_v16, %v447_v15 }
  0xfe   : > { %v427_v19 = vpop.f32.mrf.mxu2 }
  0xff   : > { %1160 = vmatmul.msk.bf16.gmra.mxu1 %vm297_vm0, %v473_v17  ;;  %v428_v20 = vadd.f32 %v1437_v53, %v427_v19 }
 0x100   : > { %v390_v21 = vpop.f32.mrf.mxu0 }
 0x101   : > { %v464_v23 = vmax.f32 %v428_v20, 0.0  ;;  %v391_v25 = vadd.f32 %v1437_v53, %v390_v21 }
 0x103   : > { %v481_v24 = vpack.c.bf16 %v464_v23, %v463_v22  ;;  %v449_v29 = vmax.f32 %v391_v25, 0.0 }
 0x105   : > { %1168 = vmatmul.msk.bf16.gmra.mxu3 %vm297_vm0, %v481_v24 }
 0x106   : > { %v430_v26 = vpop.f32.mrf.mxu2 }
 0x107   : > { %v431_v32 = vadd.f32 %v1437_v53, %v430_v26 }
 0x108   : > { %v392_v27 = vpop.f32.mrf.mxu0 }
 0x109   : > { %v393_v28 = vadd.f32 %v1437_v53, %v392_v27  ;;  %v465_v35 = vmax.f32 %v431_v32, 0.0 }
 0x10b   : > { %v450_v30 = vmax.f32 %v393_v28, 0.0 }
 0x10d   : > { %v474_v31 = vpack.c.bf16 %v450_v30, %v449_v29 }
 0x10e   : > { %v432_v33 = vpop.f32.mrf.mxu2 }
 0x10f   : > { %1161 = vmatmul.msk.bf16.gmra.mxu1 %vm297_vm0, %v474_v31  ;;  %v433_v34 = vadd.f32 %v1437_v53, %v432_v33 }
 0x111   : > { %v466_v36 = vmax.f32 %v433_v34, 0.0 }
 0x113   : > { %v482_v37 = vpack.c.bf16 %v466_v36, %v465_v35 }
 0x115   : > { %1169 = vmatmul.msk.bf16.gmra.mxu3 %vm297_vm0, %v482_v37 }
 0x11c   : > { %v560_v39 = vpop.f32.mrf.mxu1 }
 0x11d   : > { %v1493_v40 = vadd.f32 %v1490_v38, %v560_v39 }
 0x11f   : > { %v641_v41 = vsel %vm640_vm1, %v1493_v40, -inf }
 0x120   : > { %642 = vmax.xlane.f32.xlu0 %v641_v41 }
 0x124   : > { %v562_v53 = vpop.f32.mrf.mxu1 }
 0x125   : > { %v1498_v42 = vadd.f32 %v1490_v38, %v562_v53 }
 0x127   : > { %v644_v43 = vsel %vm640_vm1, %v1498_v42, -inf }
 0x128   : > { %645 = vmax.xlane.f32.xlu0 %v644_v43  ;;  %v600_v44 = vpop.f32.mrf.mxu3 }
 0x129   : > { %v1503_v45 = vadd.f32 %v1490_v38, %v600_v44 }
 0x12b   : > { %v689_v46 = vsel %vm640_vm1, %v1503_v45, -inf }
 0x12c   : > { %v565_v47 = vpop.f32.mrf.mxu1  ;;  %690 = vmax.xlane.f32.xlu1 %v689_v46 }
 0x12d   : > { %v1508_v48 = vadd.f32 %v1490_v38, %v565_v47 }
 0x12f   : > { %v647_v54 = vsel %vm640_vm1, %v1508_v48, -inf }
 0x130   : > { %v602_v49 = vpop.f32.mrf.mxu3 }
 0x131   : > { %v1511_v50 = vadd.f32 %v1490_v38, %v602_v49 }
 0x133   : > { %v692_v51 = vsel %vm640_vm1, %v1511_v50, -inf }
 0x134   : > { %v567_v52 = vpop.f32.mrf.mxu1  ;;  %693 = vmax.xlane.f32.xlu2 %v692_v51  ;;  %648 = vmax.xlane.f32.xlu1 %v647_v54 }
 0x135   : > { %v1518_v55 = vadd.f32 %v1490_v38, %v567_v52 }
 0x137   : > { %v650_v59 = vsel %vm640_vm1, %v1518_v55, -inf }
 0x138   : > { %v605_v56 = vpop.f32.mrf.mxu3 }
 0x139   : > { %v1521_v57 = vadd.f32 %v1490_v38, %v605_v56 }
 0x13b   : > { %v695_v60 = vsel %vm640_vm1, %v1521_v57, -inf }
 0x13c   : > { %v570_v58 = vpop.f32.mrf.mxu1  ;;  %651 = vmax.xlane.f32.xlu1 %v650_v59  ;;  %696 = vmax.xlane.f32.xlu0 %v695_v60 }
 0x13d   : > { %v1528_v61 = vadd.f32 %v1490_v38, %v570_v58 }
 0x13f   : > { %v653_v62 = vsel %vm640_vm1, %v1528_v61, -inf }
 0x140   : > { %654 = vmax.xlane.f32.xlu2 %v653_v62  ;;  %v607_v63 = vpop.f32.mrf.mxu3 }
 0x141   : > { %v1533_v0 = vadd.f32 %v1490_v38, %v607_v63 }
 0x143   : > { %v698_v2 = vsel %vm640_vm1, %v1533_v0, -inf }
 0x144   : > { %v572_v1 = vpop.f32.mrf.mxu1  ;;  %699 = vmax.xlane.f32.xlu1 %v698_v2 }
 0x145   : > { %v1538_v3 = vadd.f32 %v1490_v38, %v572_v1 }
 0x147   : > { %v656_v4 = vsel %vm640_vm1, %v1538_v3, -inf }
 0x148   : > { %657 = vmax.xlane.f32.xlu2 %v656_v4  ;;  %v610_v5 = vpop.f32.mrf.mxu3 }
 0x149   : > { %v1543_v6 = vadd.f32 %v1490_v38, %v610_v5 }
 0x14b   : > { %v701_v9 = vsel %vm640_vm1, %v1543_v6, -inf }
 0x14c   : > { %v575_v7 = vpop.f32.mrf.mxu1 }
 0x14d   : > { %v1546_v8 = vadd.f32 %v1490_v38, %v575_v7 }
 0x14f   : > { %v659_v10 = vsel %vm640_vm1, %v1546_v8, -inf }
 0x150   : > { %702 = vmax.xlane.f32.xlu2 %v701_v9  ;;  %660 = vmax.xlane.f32.xlu0 %v659_v10  ;;  %v612_v11 = vpop.f32.mrf.mxu3 }
 0x151   : > { %v1553_v12 = vadd.f32 %v1490_v38, %v612_v11 }
 0x153   : > { %v704_v16 = vsel %vm640_vm1, %v1553_v12, -inf }
 0x154   : > { %v577_v13 = vpop.f32.mrf.mxu1 }
 0x155   : > { %v1556_v14 = vadd.f32 %v1490_v38, %v577_v13 }
 0x157   : > { %v662_v15 = vsel %vm640_vm1, %v1556_v14, -inf }
 0x158   : > { %663 = vmax.xlane.f32.xlu1 %v662_v15  ;;  %705 = vmax.xlane.f32.xlu0 %v704_v16  ;;  %v615_v17 = vpop.f32.mrf.mxu3 }
 0x159   : > { %v1563_v18 = vadd.f32 %v1490_v38, %v615_v17 }
 0x15b   : > { %v707_v22 = vsel %vm640_vm1, %v1563_v18, -inf }
 0x15c   : > { %v580_v19 = vpop.f32.mrf.mxu1 }
 0x15d   : > { %v1566_v20 = vadd.f32 %v1490_v38, %v580_v19 }
 0x15f   : > { %v665_v21 = vsel %vm640_vm1, %v1566_v20, -inf }
 0x160   : > { %666 = vmax.xlane.f32.xlu2 %v665_v21  ;;  %708 = vmax.xlane.f32.xlu1 %v707_v22  ;;  %v617_v23 = vpop.f32.mrf.mxu3 }
 0x161   : > { %v1573_v24 = vadd.f32 %v1490_v38, %v617_v23 }
 0x163   : > { %v710_v27 = vsel %vm640_vm1, %v1573_v24, -inf }
 0x164   : > { %v582_v25 = vpop.f32.mrf.mxu1 }
 0x165   : > { %v1576_v26 = vadd.f32 %v1490_v38, %v582_v25 }
 0x167   : > { %v668_v28 = vsel %vm640_vm1, %v1576_v26, -inf }
 0x168   : > { %711 = vmax.xlane.f32.xlu2 %v710_v27  ;;  %669 = vmax.xlane.f32.xlu0 %v668_v28  ;;  %v620_v29 = vpop.f32.mrf.mxu3 }
 0x169   : > { %v1583_v30 = vadd.f32 %v1490_v38, %v620_v29 }
 0x16b   : > { %v713_v34 = vsel %vm640_vm1, %v1583_v30, -inf }
 0x16c   : > { %v585_v31 = vpop.f32.mrf.mxu1 }
 0x16d   : > { %v1586_v32 = vadd.f32 %v1490_v38, %v585_v31 }
 0x16f   : > { %v671_v33 = vsel %vm640_vm1, %v1586_v32, -inf }
 0x170   : > { %672 = vmax.xlane.f32.xlu1 %v671_v33  ;;  %714 = vmax.xlane.f32.xlu0 %v713_v34  ;;  %v622_v35 = vpop.f32.mrf.mxu3 }
 0x171   : > { %v1593_v36 = vadd.f32 %v1490_v38, %v622_v35 }
 0x173   : > { %v716_v53 = vsel %vm640_vm1, %v1593_v36, -inf }
 0x174   : > { %v587_v37 = vpop.f32.mrf.mxu1 }
 0x175   : > { %v1596_v39 = vadd.f32 %v1490_v38, %v587_v37 }
 0x177   : > { %v674_v41 = vsel %vm640_vm1, %v1596_v39, -inf }
 0x178   : > { %675 = vmax.xlane.f32.xlu2 %v674_v41  ;;  %717 = vmax.xlane.f32.xlu1 %v716_v53  ;;  %v625_v43 = vpop.f32.mrf.mxu3 }
 0x179   : > { %v1603_v44 = vadd.f32 %v1490_v38, %v625_v43 }
 0x17b   : > { %v719_v49 = vsel %vm640_vm1, %v1603_v44, -inf }
 0x17c   : > { %v590_v46 = vpop.f32.mrf.mxu1 }
 0x17d   : > { %v1606_v47 = vadd.f32 %v1490_v38, %v590_v46 }
 0x17f   : > { %v677_v51 = vsel %vm640_vm1, %v1606_v47, -inf }
 0x180   : > { %720 = vmax.xlane.f32.xlu2 %v719_v49  ;;  %678 = vmax.xlane.f32.xlu0 %v677_v51  ;;  %v627_v52 = vpop.f32.mrf.mxu3 }
 0x181   : > { %v1613_v54 = vadd.f32 %v1490_v38, %v627_v52 }
 0x183   : > { %v722_v60 = vsel %vm640_vm1, %v1613_v54, -inf }
 0x184   : > { %v592_v56 = vpop.f32.mrf.mxu1 }
 0x185   : > { %v1616_v58 = vadd.f32 %v1490_v38, %v592_v56 }
 0x187   : > { %v680_v59 = vsel %vm640_vm1, %v1616_v58, -inf }
 0x188   : > { %681 = vmax.xlane.f32.xlu1 %v680_v59  ;;  %723 = vmax.xlane.f32.xlu0 %v722_v60  ;;  %v630_v62 = vpop.f32.mrf.mxu3 }
 0x189   : > { %v1623_v63 = vadd.f32 %v1490_v38, %v630_v62 }
 0x18b   : > { %v725_v5 = vsel %vm640_vm1, %v1623_v63, -inf }
 0x18c   : > { %v595_v1 = vpop.f32.mrf.mxu1 }
 0x18d   : > { %v1626_v2 = vadd.f32 %v1490_v38, %v595_v1 }
 0x18f   : > { %v683_v4 = vsel %vm640_vm1, %v1626_v2, -inf }
 0x190   : > { %684 = vmax.xlane.f32.xlu2 %v683_v4  ;;  %726 = vmax.xlane.f32.xlu1 %v725_v5  ;;  %v632_v7 = vpop.f32.mrf.mxu3 }
 0x191   : > { %v1633_v9 = vadd.f32 %v1490_v38, %v632_v7 }
 0x193   : > { %v643_v10 = vpop.xlane.xlu0 %642  ;;  %v728_v17 = vsel %vm640_vm1, %v1633_v9, -inf }
 0x194   : > { %v1636_v11 = vsub.f32 %v1493_v40, %v643_v10  ;;  %v597_v13 = vpop.f32.mrf.mxu1 }
 0x195   : > { %v1639_v15 = vadd.f32 %v1490_v38, %v597_v13 }
 0x196   : > { %v769_v16 = vmul.f32 1.442695, %v1636_v11 }
 0x197   : > { %v686_v19 = vsel %vm640_vm1, %v1639_v15, -inf }
 0x198   : > { %1190 = vpow2.f32 %v769_v16  ;;  %729 = vmax.xlane.f32.xlu2 %v728_v17  ;;  %687 = vmax.xlane.f32.xlu0 %v686_v19  ;;  %v635_v21 = vpop.f32.mrf.mxu3 }
 0x199   : > { %v1647_v22 = vadd.f32 %v1490_v38, %v635_v21 }
 0x19b   : > { %v646_v40 = vpop.xlane.xlu0 %645  ;;  %v731_v28 = vsel %vm640_vm1, %v1647_v22, -inf }
 0x19c   : > { %v1650_v23 = vsub.f32 %v1498_v42, %v646_v40 }
 0x19e   : > { %v1191_v25 = vpop.eup %1190  ;;  %v771_v27 = vmul.f32 1.442695, %v1650_v23 }
 0x19f   : > { %v833_v29 = vsel %vm640_vm1, %v1191_v25, 0.0  ;;  %v691_v31 = vpop.xlane.xlu1 %690 }
 0x1a0   : > { %1192 = vpow2.f32 %v771_v27  ;;  %732 = vmax.xlane.f32.xlu0 %v731_v28  ;;  %834 = vadd.xlane.f32.xlu2 %v833_v29  ;;  %v1657_v33 = vsub.f32 %v1503_v45, %v691_v31  ;;  %v637_v34 = vpop.f32.mrf.mxu3 }
 0x1a1   : > { %v1660_v35 = vadd.f32 %v1490_v38, %v637_v34 }
 0x1a2   : > { %v801_v42 = vmul.f32 1.442695, %v1657_v33 }
 0x1a3   : > { %v734_v37 = vsel %vm640_vm1, %v1660_v35, -inf }
 0x1a4   : > { %735 = vmax.xlane.f32.xlu1 %v734_v37  ;;  %1194 = vpow2.f32 %v801_v42 }
 0x1a6   : > { %v1193_v41 = vpop.eup %1192 }
 0x1a7   : > { %v836_v53 = vsel %vm640_vm1, %v1193_v41, 0.0  ;;  %v649_v43 = vpop.xlane.xlu1 %648  ;;  %v694_v46 = vpop.xlane.xlu2 %693 }
 0x1a8   : > { %837 = vadd.xlane.f32.xlu0 %v836_v53  ;;  %v1667_v45 = vsub.f32 %v1508_v48, %v649_v43  ;;  %v1671_v51 = vsub.f32 %v1511_v50, %v694_v46 }
 0x1aa   : > { %v773_v49 = vmul.f32 1.442695, %v1667_v45  ;;  %v1195_v38 = vpop.eup %1194  ;;  %v803_v56 = vmul.f32 1.442695, %v1671_v51 }
 0x1ab   : > { %v881_v52 = vsel %vm640_vm1, %v1195_v38, 0.0 }
 0x1ac   : > { %1196 = vpow2.f32 %v773_v49 }
 0x1ad   : > { %1198 = vpow2.f32 %v803_v56 }
 0x1af   : > { %v652_v59 = vpop.xlane.xlu1 %651  ;;  %v697_v60 = vpop.xlane.xlu0 %696 }
 0x1b0   : > { %882 = vadd.xlane.f32.xlu0 %v881_v52  ;;  %v1676_v62 = vsub.f32 %v1518_v55, %v652_v59  ;;  %v1680_v1 = vsub.f32 %v1521_v57, %v697_v60 }
 0x1b2   : > { %v775_v48 = vmul.f32 1.442695, %v1676_v62  ;;  %v1197_v5 = vpop.eup %1196  ;;  %v805_v55 = vmul.f32 1.442695, %v1680_v1 }
 0x1b3   : > { %v655_v4 = vpop.xlane.xlu2 %654  ;;  %v839_v7 = vsel %vm640_vm1, %v1197_v5, 0.0  ;;  %v1199_v57 = vpop.eup %1198 }
 0x1b4   : > { %v1683_v50 = vsub.f32 %v1528_v61, %v655_v4  ;;  %1200 = vpow2.f32 %v775_v48  ;;  %840 = vadd.xlane.f32.xlu1 %v839_v7  ;;  %v884_v25 = vsel %vm640_vm1, %v1199_v57, 0.0 }
 0x1b6   : > { %v777_v10 = vmul.f32 1.442695, %v1683_v50 }
 0x1b7   : > { %v700_v13 = vpop.xlane.xlu1 %699 }
 0x1b8   : > { %1202 = vpow2.f32 %v777_v10  ;;  %v1689_v16 = vsub.f32 %v1533_v0, %v700_v13 }
 0x1b9   : > { %1204 = vpow2.f32 %v805_v55 }
 0x1ba   : > { %v1201_v17 = vpop.eup %1200  ;;  %v807_v19 = vmul.f32 1.442695, %v1689_v16 }
 0x1bb   : > { %v658_v61 = vpop.xlane.xlu2 %657  ;;  %v842_v40 = vsel %vm640_vm1, %v1201_v17, 0.0 }
 0x1bc   : > { %v1693_v21 = vsub.f32 %v1538_v3, %v658_v61  ;;  %843 = vadd.xlane.f32.xlu2 %v842_v40  ;;  %1206 = vpow2.f32 %v807_v19  ;;  %885 = vadd.xlane.f32.xlu1 %v884_v25 }
 0x1be   : > { %v1203_v27 = vpop.eup %1202  ;;  %v779_v28 = vmul.f32 1.442695, %v1693_v21 }
 0x1bf   : > { %v845_v0 = vsel %vm640_vm1, %v1203_v27, 0.0  ;;  %v1205_v29 = vpop.eup %1204 }
 0x1c0   : > { %1208 = vpow2.f32 %v779_v28  ;;  %846 = vadd.xlane.f32.xlu0 %v845_v0  ;;  %v887_v41 = vsel %vm640_vm1, %v1205_v29, 0.0 }
 0x1c2   : > { %v1207_v42 = vpop.eup %1206 }
 0x1c3   : > { %v703_v31 = vpop.xlane.xlu2 %702  ;;  %v661_v34 = vpop.xlane.xlu0 %660  ;;  %v890_v38 = vsel %vm640_vm1, %v1207_v42, 0.0 }
 0x1c4   : > { %v1700_v3 = vsub.f32 %v1543_v6, %v703_v31  ;;  %v1703_v37 = vsub.f32 %v1546_v8, %v661_v34  ;;  %888 = vadd.xlane.f32.xlu2 %v887_v41 }
 0x1c6   : > { %v1209_v53 = vpop.eup %1208  ;;  %v809_v43 = vmul.f32 1.442695, %v1700_v3  ;;  %v781_v46 = vmul.f32 1.442695, %v1703_v37 }
 0x1c7   : > { %v848_v49 = vsel %vm640_vm1, %v1209_v53, 0.0 }
 0x1c8   : > { %1210 = vpow2.f32 %v809_v43  ;;  %849 = vadd.xlane.f32.xlu1 %v848_v49  ;;  %891 = vadd.xlane.f32.xlu0 %v890_v38 }
 0x1c9   : > { %1212 = vpow2.f32 %v781_v46 }
 0x1cb   : > { %v664_v6 = vpop.xlane.xlu1 %663  ;;  %v706_v52 = vpop.xlane.xlu0 %705 }
 0x1cc   : > { %v1711_v8 = vsub.f32 %v1556_v14, %v664_v6  ;;  %v1714_v56 = vsub.f32 %v1553_v12, %v706_v52 }
 0x1ce   : > { %v1211_v59 = vpop.eup %1210  ;;  %v783_v60 = vmul.f32 1.442695, %v1711_v8  ;;  %v811_v48 = vmul.f32 1.442695, %v1714_v56 }
 0x1cf   : > { %v1213_v4 = vpop.eup %1212  ;;  %v893_v5 = vsel %vm640_vm1, %v1211_v59, 0.0 }
 0x1d0   : > { %1214 = vpow2.f32 %v783_v60  ;;  %894 = vadd.xlane.f32.xlu1 %v893_v5  ;;  %v851_v7 = vsel %vm640_vm1, %v1213_v4, 0.0 }
 0x1d1   : > { %1216 = vpow2.f32 %v811_v48  ;;  %852 = vadd.xlane.f32.xlu2 %v851_v7 }
 0x1d3   : > { %v667_v10 = vpop.xlane.xlu2 %666  ;;  %v709_v14 = vpop.xlane.xlu1 %708 }
 0x1d4   : > { %v1721_v55 = vsub.f32 %v1566_v20, %v667_v10  ;;  %v1724_v12 = vsub.f32 %v1563_v18, %v709_v14 }
 0x1d6   : > { %v1215_v13 = vpop.eup %1214  ;;  %v785_v57 = vmul.f32 1.442695, %v1721_v55  ;;  %v813_v17 = vmul.f32 1.442695, %v1724_v12 }
 0x1d7   : > { %v1217_v19 = vpop.eup %1216  ;;  %v854_v61 = vsel %vm640_vm1, %v1215_v13, 0.0 }
 0x1d8   : > { %1218 = vpow2.f32 %v785_v57  ;;  %855 = vadd.xlane.f32.xlu0 %v854_v61  ;;  %v896_v40 = vsel %vm640_vm1, %v1217_v19, 0.0 }
 0x1d9   : > { %1220 = vpow2.f32 %v813_v17  ;;  %897 = vadd.xlane.f32.xlu2 %v896_v40 }
 0x1db   : > { %v712_v25 = vpop.xlane.xlu2 %711  ;;  %v670_v20 = vpop.xlane.xlu0 %669 }
 0x1dc   : > { %v1731_v27 = vsub.f32 %v1573_v24, %v712_v25  ;;  %v1734_v18 = vsub.f32 %v1576_v26, %v670_v20 }
 0x1de   : > { %v1219_v28 = vpop.eup %1218  ;;  %v815_v0 = vmul.f32 1.442695, %v1731_v27  ;;  %v787_v29 = vmul.f32 1.442695, %v1734_v18 }
 0x1df   : > { %v1221_v31 = vpop.eup %1220  ;;  %v857_v34 = vsel %vm640_vm1, %v1219_v28, 0.0 }
 0x1e0   : > { %1222 = vpow2.f32 %v815_v0  ;;  %858 = vadd.xlane.f32.xlu1 %v857_v34  ;;  %v899_v42 = vsel %vm640_vm1, %v1221_v31, 0.0 }
 0x1e1   : > { %1224 = vpow2.f32 %v787_v29  ;;  %900 = vadd.xlane.f32.xlu0 %v899_v42 }
 0x1e3   : > { %v673_v41 = vpop.xlane.xlu1 %672  ;;  %v715_v24 = vpop.xlane.xlu0 %714 }
 0x1e4   : > { %v1741_v53 = vsub.f32 %v1586_v32, %v673_v41  ;;  %v1744_v26 = vsub.f32 %v1583_v30, %v715_v24 }
 0x1e6   : > { %v1223_v43 = vpop.eup %1222  ;;  %v789_v46 = vmul.f32 1.442695, %v1741_v53  ;;  %v817_v49 = vmul.f32 1.442695, %v1744_v26 }
 0x1e7   : > { %v1225_v38 = vpop.eup %1224  ;;  %v902_v6 = vsel %vm640_vm1, %v1223_v43, 0.0 }
 0x1e8   : > { %1226 = vpow2.f32 %v789_v46  ;;  %903 = vadd.xlane.f32.xlu1 %v902_v6  ;;  %v860_v52 = vsel %vm640_vm1, %v1225_v38, 0.0 }
 0x1e9   : > { %1228 = vpow2.f32 %v817_v49  ;;  %861 = vadd.xlane.f32.xlu2 %v860_v52 }
 0x1eb   : > { %v676_v59 = vpop.xlane.xlu2 %675  ;;  %v718_v32 = vpop.xlane.xlu1 %717 }
 0x1ec   : > { %v1751_v60 = vsub.f32 %v1596_v39, %v676_v59  ;;  %v1754_v30 = vsub.f32 %v1593_v36, %v718_v32 }
 0x1ee   : > { %v1227_v48 = vpop.eup %1226  ;;  %v791_v4 = vmul.f32 1.442695, %v1751_v60  ;;  %v819_v5 = vmul.f32 1.442695, %v1754_v30 }
 0x1ef   : > { %v1229_v7 = vpop.eup %1228  ;;  %v863_v10 = vsel %vm640_vm1, %v1227_v48, 0.0 }
 0x1f0   : > { %1230 = vpow2.f32 %v791_v4  ;;  %864 = vadd.xlane.f32.xlu0 %v863_v10  ;;  %v905_v14 = vsel %vm640_vm1, %v1229_v7, 0.0 }
 0x1f1   : > { %1232 = vpow2.f32 %v819_v5  ;;  %906 = vadd.xlane.f32.xlu2 %v905_v14 }
 0x1f3   : > { %v721_v13 = vpop.xlane.xlu2 %720  ;;  %v679_v39 = vpop.xlane.xlu0 %678 }
 0x1f4   : > { %v1761_v57 = vsub.f32 %v1603_v44, %v721_v13  ;;  %v1764_v36 = vsub.f32 %v1606_v47, %v679_v39 }
 0x1f6   : > { %v1231_v17 = vpop.eup %1230  ;;  %v821_v19 = vmul.f32 1.442695, %v1761_v57  ;;  %v793_v61 = vmul.f32 1.442695, %v1764_v36 }
 0x1f7   : > { %v1233_v40 = vpop.eup %1232  ;;  %v866_v25 = vsel %vm640_vm1, %v1231_v17, 0.0 }
 0x1f8   : > { %1234 = vpow2.f32 %v821_v19  ;;  %867 = vadd.xlane.f32.xlu1 %v866_v25  ;;  %v908_v20 = vsel %vm640_vm1, %v1233_v40, 0.0 }
 0x1f9   : > { %1236 = vpow2.f32 %v793_v61  ;;  %909 = vadd.xlane.f32.xlu0 %v908_v20 }
 0x1fb   : > { %v682_v28 = vpop.xlane.xlu1 %681  ;;  %v724_v44 = vpop.xlane.xlu0 %723 }
 0x1fc   : > { %v1771_v0 = vsub.f32 %v1616_v58, %v682_v28  ;;  %v1774_v47 = vsub.f32 %v1613_v54, %v724_v44 }
 0x1fe   : > { %v1235_v29 = vpop.eup %1234  ;;  %v795_v31 = vmul.f32 1.442695, %v1771_v0  ;;  %v823_v34 = vmul.f32 1.442695, %v1774_v47 }
 0x1ff   : > { %v1237_v42 = vpop.eup %1236  ;;  %v911_v41 = vsel %vm640_vm1, %v1235_v29, 0.0 }
 0x200   : > { %1238 = vpow2.f32 %v795_v31  ;;  %912 = vadd.xlane.f32.xlu1 %v911_v41  ;;  %v869_v24 = vsel %vm640_vm1, %v1237_v42, 0.0 }
 0x201   : > { %1240 = vpow2.f32 %v823_v34  ;;  %870 = vadd.xlane.f32.xlu2 %v869_v24 }
 0x203   : > { %v685_v43 = vpop.xlane.xlu2 %684  ;;  %v727_v58 = vpop.xlane.xlu1 %726 }
 0x204   : > { %v1781_v46 = vsub.f32 %v1626_v2, %v685_v43  ;;  %v1784_v54 = vsub.f32 %v1623_v63, %v727_v58 }
 0x206   : > { %v1239_v49 = vpop.eup %1238  ;;  %v797_v38 = vmul.f32 1.442695, %v1781_v46  ;;  %v825_v6 = vmul.f32 1.442695, %v1784_v54 }
 0x207   : > { %v1241_v52 = vpop.eup %1240  ;;  %v872_v59 = vsel %vm640_vm1, %v1239_v49, 0.0 }
 0x208   : > { %1242 = vpow2.f32 %v797_v38  ;;  %873 = vadd.xlane.f32.xlu0 %v872_v59  ;;  %v914_v32 = vsel %vm640_vm1, %v1241_v52, 0.0 }
 0x209   : > { %1244 = vpow2.f32 %v825_v6  ;;  %915 = vadd.xlane.f32.xlu2 %v914_v32 }
 0x20b   : > { %v730_v48 = vpop.xlane.xlu2 %729  ;;  %v688_v2 = vpop.xlane.xlu0 %687 }
 0x20c   : > { %v1791_v4 = vsub.f32 %v1633_v9, %v730_v48  ;;  %v1794_v63 = vsub.f32 %v1639_v15, %v688_v2 }
 0x20e   : > { %v1243_v5 = vpop.eup %1242  ;;  %v827_v7 = vmul.f32 1.442695, %v1791_v4  ;;  %v799_v10 = vmul.f32 1.442695, %v1794_v63 }
 0x20f   : > { %v1245_v14 = vpop.eup %1244  ;;  %v875_v13 = vsel %vm640_vm1, %v1243_v5, 0.0 }
 0x210   : > { %1246 = vpow2.f32 %v827_v7  ;;  %876 = vadd.xlane.f32.xlu1 %v875_v13  ;;  %v917_v39 = vsel %vm640_vm1, %v1245_v14, 0.0 }
 0x211   : > { %1248 = vpow2.f32 %v799_v10  ;;  %918 = vadd.xlane.f32.xlu0 %v917_v39 }
 0x213   : > { %v835_v17 = vpop.xlane.xlu2 %834  ;;  %v733_v9 = vpop.xlane.xlu0 %732 }
 0x214   : > { %1250 = vlog2.f32 %v835_v17  ;;  %v1801_v15 = vsub.f32 %v1647_v22, %v733_v9 }
 0x216   : > { %v1247_v19 = vpop.eup %1246  ;;  %v829_v61 = vmul.f32 1.442695, %v1801_v15 }
 0x217   : > { %v1249_v40 = vpop.eup %1248  ;;  %v920_v25 = vsel %vm640_vm1, %v1247_v19, 0.0  ;;  %v736_v20 = vpop.xlane.xlu1 %735 }
 0x218   : > { %1252 = vpow2.f32 %v829_v61  ;;  %921 = vadd.xlane.f32.xlu1 %v920_v25  ;;  %v878_v28 = vsel %vm640_vm1, %v1249_v40, 0.0  ;;  %v1807_v44 = vsub.f32 %v1660_v35, %v736_v20 }
 0x219   : > { %879 = vadd.xlane.f32.xlu2 %v878_v28 }
 0x21a   : > { %v1251_v29 = vpop.eup %1250  ;;  %v831_v22 = vmul.f32 1.442695, %v1807_v44 }
 0x21b   : > { %v930_v31 = vmul.f32 0.6931472, %v1251_v29  ;;  %v838_v34 = vpop.xlane.xlu0 %837 }
 0x21c   : > { %1254 = vlog2.f32 %v838_v34 }
 0x21d   : > { %v993_v42 = vsub.f32 %v1636_v11, %v930_v31  ;;  %1256 = vpow2.f32 %v831_v22 }
 0x21e   : > { %v1253_v35 = vpop.eup %1252 }
 0x21f   : > { %1025 = vst.msk [vmem:[%s1815_s14] sm:$0xff] %vm640_vm1, %v993_v42  ;;  %v923_v41 = vsel %vm640_vm1, %v1253_v35, 0.0 }
 0x221   : > { %924 = vadd.xlane.f32.xlu2 %v923_v41 }
 0x222   : > { %v1255_v24 = vpop.eup %1254 }
 0x223   : > { %v1257_v43 = vpop.eup %1256  ;;  %v932_v58 = vmul.f32 0.6931472, %v1255_v24  ;;  %v883_v49 = vpop.xlane.xlu0 %882 }
 0x224   : > { %1258 = vlog2.f32 %v883_v49  ;;  %v926_v38 = vsel %vm640_vm1, %v1257_v43, 0.0 }
 0x225   : > { %v994_v6 = vsub.f32 %v1650_v23, %v932_v58  ;;  %927 = vadd.xlane.f32.xlu0 %v926_v38 }
 0x227   : > { %1026 = vst.msk [vmem:[%s1815_s14 + $0x8] sm:$0xff] %vm640_vm1, %v994_v6  ;;  %v841_v11 = vpop.xlane.xlu1 %840 }
 0x228   : > { %1260 = vlog2.f32 %v841_v11 }
 0x22a   : > { %v1259_v52 = vpop.eup %1258 }
 0x22b   : > { %v962_v59 = vmul.f32 0.6931472, %v1259_v52 }
 0x22d   : > { %v1009_v32 = vsub.f32 %v1657_v33, %v962_v59 }
 0x22e   : > { %v1261_v48 = vpop.eup %1260 }
 0x22f   : > { %1041 = vst.msk [vmem:[%s1815_s14 + $0x80] sm:$0xff] %vm640_vm1, %v1009_v32  ;;  %v844_v2 = vpop.xlane.xlu2 %843  ;;  %v934_v5 = vmul.f32 0.6931472, %v1261_v48  ;;  %v886_v7 = vpop.xlane.xlu1 %885 }
 0x230   : > { %1262 = vlog2.f32 %v844_v2 }
 0x231   : > { %1264 = vlog2.f32 %v886_v7  ;;  %v995_v23 = vsub.f32 %v1667_v45, %v934_v5 }
 0x233   : > { %v847_v10 = vpop.xlane.xlu0 %846  ;;  %1027 = vst.msk [vmem:[%s1815_s14 + $0x10] sm:$0xff] %vm640_vm1, %v995_v23 }
 0x234   : > { %1266 = vlog2.f32 %v847_v10 }
 0x236   : > { %v1263_v14 = vpop.eup %1262 }
 0x237   : > { %v1265_v13 = vpop.eup %1264  ;;  %v936_v39 = vmul.f32 0.6931472, %v1263_v14  ;;  %v889_v33 = vpop.xlane.xlu2 %888 }
 0x238   : > { %v964_v17 = vmul.f32 0.6931472, %v1265_v13  ;;  %1268 = vlog2.f32 %v889_v33 }
 0x239   : > { %v996_v19 = vsub.f32 %v1676_v62, %v936_v39 }
 0x23a   : > { %v1267_v9 = vpop.eup %1266  ;;  %v1010_v61 = vsub.f32 %v1671_v51, %v964_v17 }
 0x23b   : > { %v938_v40 = vmul.f32 0.6931472, %v1267_v9  ;;  %v850_v45 = vpop.xlane.xlu1 %849  ;;  %v892_v25 = vpop.xlane.xlu0 %891  ;;  %1028 = vst.msk [vmem:[%s1815_s14 + $0x18] sm:$0xff] %vm640_vm1, %v996_v19 }
 0x23c   : > { %1270 = vlog2.f32 %v850_v45  ;;  %1042 = vst.msk [vmem:[%s1815_s14 + $0x88] sm:$0xff] %vm640_vm1, %v1010_v61 }
 0x23d   : > { %v997_v20 = vsub.f32 %v1683_v50, %v938_v40  ;;  %1272 = vlog2.f32 %v892_v25 }
 0x23e   : > { %v1269_v28 = vpop.eup %1268 }
 0x23f   : > { %1029 = vst.msk [vmem:[%s1815_s14 + $0x20] sm:$0xff] %vm640_vm1, %v997_v20  ;;  %v966_v62 = vmul.f32 0.6931472, %v1269_v28 }
 0x241   : > { %v1011_v51 = vsub.f32 %v1680_v1, %v966_v62 }
 0x242   : > { %v1271_v29 = vpop.eup %1270 }
 0x243   : > { %v1273_v31 = vpop.eup %1272  ;;  %v940_v22 = vmul.f32 0.6931472, %v1271_v29  ;;  %v895_v34 = vpop.xlane.xlu1 %894  ;;  %1043 = vst.msk [vmem:[%s1815_s14 + $0x90] sm:$0xff] %vm640_vm1, %v1011_v51 }
 0x244   : > { %v968_v42 = vmul.f32 0.6931472, %v1273_v31  ;;  %1274 = vlog2.f32 %v895_v34  ;;  %v853_v35 = vpop.xlane.xlu2 %852 }
 0x245   : > { %v998_v50 = vsub.f32 %v1693_v21, %v940_v22  ;;  %1276 = vlog2.f32 %v853_v35 }
 0x246   : > { %v1012_v41 = vsub.f32 %v1689_v16, %v968_v42 }
 0x247   : > { %1030 = vst.msk [vmem:[%s1815_s14 + $0x28] sm:$0xff] %vm640_vm1, %v998_v50 }
 0x248   : > { %1044 = vst.msk [vmem:[%s1815_s14 + $0x98] sm:$0xff] %vm640_vm1, %v1012_v41 }
 0x24a   : > { %v1275_v1 = vpop.eup %1274 }
 0x24b   : > { %v1277_v24 = vpop.eup %1276  ;;  %v970_v43 = vmul.f32 0.6931472, %v1275_v1  ;;  %v856_v58 = vpop.xlane.xlu0 %855 }
 0x24c   : > { %v942_v49 = vmul.f32 0.6931472, %v1277_v24  ;;  %v898_v38 = vpop.xlane.xlu2 %897  ;;  %1278 = vlog2.f32 %v856_v58 }
 0x24d   : > { %v1013_v6 = vsub.f32 %v1700_v3, %v970_v43  ;;  %1280 = vlog2.f32 %v898_v38 }
 0x24e   : > { %v999_v21 = vsub.f32 %v1703_v37, %v942_v49 }
 0x24f   : > { %1045 = vst.msk [vmem:[%s1815_s14 + $0xa0] sm:$0xff] %vm640_vm1, %v1013_v6 }
 0x250   : > { %1031 = vst.msk [vmem:[%s1815_s14 + $0x30] sm:$0xff] %vm640_vm1, %v999_v21 }
 0x252   : > { %v1279_v16 = vpop.eup %1278 }
 0x253   : > { %v1281_v11 = vpop.eup %1280  ;;  %v944_v52 = vmul.f32 0.6931472, %v1279_v16  ;;  %v859_v59 = vpop.xlane.xlu1 %858 }
 0x254   : > { %v972_v32 = vmul.f32 0.6931472, %v1281_v11  ;;  %1282 = vlog2.f32 %v859_v59  ;;  %v901_v48 = vpop.xlane.xlu0 %900 }
 0x255   : > { %v1000_v2 = vsub.f32 %v1711_v8, %v944_v52  ;;  %1284 = vlog2.f32 %v901_v48 }
 0x256   : > { %v1014_v3 = vsub.f32 %v1714_v56, %v972_v32 }
 0x257   : > { %1032 = vst.msk [vmem:[%s1815_s14 + $0x38] sm:$0xff] %vm640_vm1, %v1000_v2 }
 0x258   : > { %1046 = vst.msk [vmem:[%s1815_s14 + $0xa8] sm:$0xff] %vm640_vm1, %v1014_v3 }
 0x25a   : > { %v1283_v37 = vpop.eup %1282 }
 0x25b   : > { %v1285_v5 = vpop.eup %1284  ;;  %v946_v7 = vmul.f32 0.6931472, %v1283_v37  ;;  %v904_v23 = vpop.xlane.xlu1 %903 }
 0x25c   : > { %v974_v10 = vmul.f32 0.6931472, %v1285_v5  ;;  %1286 = vlog2.f32 %v904_v23  ;;  %v862_v14 = vpop.xlane.xlu2 %861 }
 0x25d   : > { %v1001_v13 = vsub.f32 %v1721_v55, %v946_v7  ;;  %1288 = vlog2.f32 %v862_v14 }
 0x25e   : > { %v1015_v8 = vsub.f32 %v1724_v12, %v974_v10 }
 0x25f   : > { %1033 = vst.msk [vmem:[%s1815_s14 + $0x40] sm:$0xff] %vm640_vm1, %v1001_v13 }
 0x260   : > { %1047 = vst.msk [vmem:[%s1815_s14 + $0xb0] sm:$0xff] %vm640_vm1, %v1015_v8 }
 0x262   : > { %v1287_v56 = vpop.eup %1286 }
 0x263   : > { %v1289_v39 = vpop.eup %1288  ;;  %v976_v33 = vmul.f32 0.6931472, %v1287_v56  ;;  %v865_v17 = vpop.xlane.xlu0 %864 }
 0x264   : > { %v948_v9 = vmul.f32 0.6931472, %v1289_v39  ;;  %v907_v19 = vpop.xlane.xlu2 %906  ;;  %1290 = vlog2.f32 %v865_v17 }
 0x265   : > { %v1016_v61 = vsub.f32 %v1731_v27, %v976_v33  ;;  %1292 = vlog2.f32 %v907_v19 }
 0x266   : > { %v1002_v55 = vsub.f32 %v1734_v18, %v948_v9 }
 0x267   : > { %1048 = vst.msk [vmem:[%s1815_s14 + $0xb8] sm:$0xff] %vm640_vm1, %v1016_v61 }
 0x268   : > { %1034 = vst.msk [vmem:[%s1815_s14 + $0x48] sm:$0xff] %vm640_vm1, %v1002_v55 }
 0x26a   : > { %v1291_v12 = vpop.eup %1290 }
 0x26b   : > { %v1293_v40 = vpop.eup %1292  ;;  %v950_v45 = vmul.f32 0.6931472, %v1291_v12  ;;  %v868_v25 = vpop.xlane.xlu1 %867 }
 0x26c   : > { %v978_v20 = vmul.f32 0.6931472, %v1293_v40  ;;  %1294 = vlog2.f32 %v868_v25  ;;  %v910_v28 = vpop.xlane.xlu0 %909 }
 0x26d   : > { %v1003_v62 = vsub.f32 %v1741_v53, %v950_v45  ;;  %1296 = vlog2.f32 %v910_v28 }
 0x26e   : > { %v1017_v27 = vsub.f32 %v1744_v26, %v978_v20 }
 0x26f   : > { %1035 = vst.msk [vmem:[%s1815_s14 + $0x50] sm:$0xff] %vm640_vm1, %v1003_v62 }
 0x270   : > { %1049 = vst.msk [vmem:[%s1815_s14 + $0xc0] sm:$0xff] %vm640_vm1, %v1017_v27 }
 0x272   : > { %v1295_v18 = vpop.eup %1294 }
 0x273   : > { %v1297_v29 = vpop.eup %1296  ;;  %v952_v51 = vmul.f32 0.6931472, %v1295_v18  ;;  %v913_v31 = vpop.xlane.xlu1 %912 }
 0x274   : > { %v980_v22 = vmul.f32 0.6931472, %v1297_v29  ;;  %1298 = vlog2.f32 %v913_v31  ;;  %v871_v34 = vpop.xlane.xlu2 %870 }
 0x275   : > { %v1004_v42 = vsub.f32 %v1751_v60, %v952_v51  ;;  %1300 = vlog2.f32 %v871_v34 }
 0x276   : > { %v1018_v53 = vsub.f32 %v1754_v30, %v980_v22 }
 0x277   : > { %1036 = vst.msk [vmem:[%s1815_s14 + $0x58] sm:$0xff] %vm640_vm1, %v1004_v42 }
 0x278   : > { %1050 = vst.msk [vmem:[%s1815_s14 + $0xc8] sm:$0xff] %vm640_vm1, %v1018_v53 }
 0x27a   : > { %v1299_v26 = vpop.eup %1298 }
 0x27b   : > { %v1301_v35 = vpop.eup %1300  ;;  %v982_v50 = vmul.f32 0.6931472, %v1299_v26  ;;  %v874_v41 = vpop.xlane.xlu0 %873 }
 0x27c   : > { %v954_v1 = vmul.f32 0.6931472, %v1301_v35  ;;  %v916_v24 = vpop.xlane.xlu2 %915  ;;  %1302 = vlog2.f32 %v874_v41 }
 0x27d   : > { %v1019_v43 = vsub.f32 %v1761_v57, %v982_v50  ;;  %1304 = vlog2.f32 %v916_v24 }
 0x27e   : > { %v1005_v60 = vsub.f32 %v1764_v36, %v954_v1 }
 0x27f   : > { %1051 = vst.msk [vmem:[%s1815_s14 + $0xd0] sm:$0xff] %vm640_vm1, %v1019_v43 }
 0x280   : > { %1037 = vst.msk [vmem:[%s1815_s14 + $0x60] sm:$0xff] %vm640_vm1, %v1005_v60 }
 0x282   : > { %v1303_v30 = vpop.eup %1302 }
 0x283   : > { %v1305_v58 = vpop.eup %1304  ;;  %v956_v49 = vmul.f32 0.6931472, %v1303_v30  ;;  %v877_v38 = vpop.xlane.xlu1 %876 }
 0x284   : > { %v984_v6 = vmul.f32 0.6931472, %v1305_v58  ;;  %1306 = vlog2.f32 %v877_v38  ;;  %v919_v21 = vpop.xlane.xlu0 %918 }
 0x285   : > { %v1006_v16 = vsub.f32 %v1771_v0, %v956_v49  ;;  %1308 = vlog2.f32 %v919_v21 }
 0x286   : > { %v1020_v57 = vsub.f32 %v1774_v47, %v984_v6 }
 0x287   : > { %1038 = vst.msk [vmem:[%s1815_s14 + $0x68] sm:$0xff] %vm640_vm1, %v1006_v16 }
 0x288   : > { %1052 = vst.msk [vmem:[%s1815_s14 + $0xd8] sm:$0xff] %vm640_vm1, %v1020_v57 }
 0x28a   : > { %v1307_v36 = vpop.eup %1306 }
 0x28b   : > { %v1309_v11 = vpop.eup %1308  ;;  %v958_v52 = vmul.f32 0.6931472, %v1307_v36  ;;  %v922_v59 = vpop.xlane.xlu1 %921 }
 0x28c   : > { %v986_v32 = vmul.f32 0.6931472, %v1309_v11  ;;  %1310 = vlog2.f32 %v922_v59  ;;  %v880_v48 = vpop.xlane.xlu2 %879 }
 0x28d   : > { %v1007_v2 = vsub.f32 %v1781_v46, %v958_v52  ;;  %1312 = vlog2.f32 %v880_v48 }
 0x28e   : > { %v1021_v0 = vsub.f32 %v1784_v54, %v986_v32 }
 0x28f   : > { %1039 = vst.msk [vmem:[%s1815_s14 + $0x70] sm:$0xff] %vm640_vm1, %v1007_v2 }
 0x290   : > { %1053 = vst.msk [vmem:[%s1815_s14 + $0xe0] sm:$0xff] %vm640_vm1, %v1021_v0 }
 0x292   : > { %v1311_v47 = vpop.eup %1310 }
 0x293   : > { %v1313_v3 = vpop.eup %1312  ;;  %v988_v37 = vmul.f32 0.6931472, %v1311_v47 }
 0x294   : > { %v960_v5 = vmul.f32 0.6931472, %v1313_v3  ;;  %v925_v7 = vpop.xlane.xlu2 %924 }
 0x295   : > { %v1022_v23 = vsub.f32 %v1791_v4, %v988_v37  ;;  %1314 = vlog2.f32 %v925_v7 }
 0x296   : > { %v1008_v10 = vsub.f32 %v1794_v63, %v960_v5 }
 0x297   : > { %1054 = vst.msk [vmem:[%s1815_s14 + $0xe8] sm:$0xff] %vm640_vm1, %v1022_v23 }
 0x298   : > { %1040 = vst.msk [vmem:[%s1815_s14 + $0x78] sm:$0xff] %vm640_vm1, %v1008_v10  ;;  %v928_v46 = vpop.xlane.xlu0 %927 }
 0x299   : > { %1316 = vlog2.f32 %v928_v46 }
 0x29b   : > { %v1315_v54 = vpop.eup %1314 }
 0x29c   : > { %v990_v14 = vmul.f32 0.6931472, %v1315_v54 }
 0x29e   : > { %v1023_v13 = vsub.f32 %v1801_v15, %v990_v14 }
 0x29f   : > { %v1317_v8 = vpop.eup %1316 }
 0x2a0   : > { %1055 = vst.msk [vmem:[%s1815_s14 + $0xf0] sm:$0xff] %vm640_vm1, %v1023_v13  ;;  %v992_v56 = vmul.f32 0.6931472, %v1317_v8 }
 0x2a2   : > { %v1024_v39 = vsub.f32 %v1807_v44, %v992_v56 }
 0x2a4   : > { %1056 = vst.msk [vmem:[%s1815_s14 + $0xf8] sm:$0xff] %vm640_vm1, %v1024_v39 }
 0x2a5 PF: > { %s15_s18 = sadd.s32 1, %s1324_s18  }
 0x2a6   : > { %p12_p4 = scmp.ge.s32.totalorder %s15_s18, 4  }
 0x2a8   :  { %14 = sbr.rel (!%p12_p4) target bundleno = 1 (0x1), region = 70 }

</bundles_post_ra>
